<compile_context>
chip_gen: v7x
topology: tpu7x:2x2x1
jax: 0.10.0
libtpu: 0.0.40
codegen_flags: <defaults>
</compile_context>

<pallas_src>
import functools

import jax
import jax.numpy as jnp
from jax.experimental import pallas as pl
from jax.experimental.pallas import tpu as pltpu


def _choose_tile_p(P, C, itemsize):
    """Largest spatial tile (multiple of 128 dividing P) with a small VMEM working set."""
    c_pad = max(8, -(-C // 8) * 8)                # class axis sits on sublanes -> pads to 8
    per_lane = c_pad * (2 * itemsize + 3 * 4)     # 2x double-buffered input + ~3 f32 temps
    budget = 8 * 1024 * 1024                      # small fraction of v7x 32 MiB scoped VMEM
    cap = max(128, min(8192, (budget // per_lane) // 128 * 128))
    if P % 128 != 0 or P <= cap:
        # TODO(synk): spatial sizes that are not a multiple of 128 fall back to one tile
        # per example; a lane-validity mask would be needed to tile those cleanly.
        return P
    t = min(cap, (P // 128) * 128)
    while t > 128 and P % t != 0:
        t -= 128
    return t if P % t == 0 else P


def _trim_sparse_loss_kernel(mask_ref, fetch_ref, logits_ref, labels_ref, out_ref, acc_ref):
    # mask_ref:  [N] int32 (SMEM, scalar prefetch)  1 if example has any nonzero label
    # fetch_ref: [N] int32 (SMEM, scalar prefetch)  block index to fetch for example n
    # logits_ref: (1, C, TILE_P)   native dtype     labels_ref: (1, 1, TILE_P) int32
    # out_ref:   (1,) f32 SMEM output               acc_ref: (1,) f32 SMEM scratch
    p = pl.program_id(0)
    n = pl.program_id(1)

    @pl.when(jnp.logical_and(p == 0, n == 0))
    def _():
        acc_ref[0] = jnp.float32(0.0)

    # Skip all compute for examples whose label map is empty (their tiles are also not
    # re-DMA'd: fetch_ref repeats the previous example's block index).
    @pl.when(mask_ref[n] != 0)
    def _():
        logits = logits_ref[0].astype(jnp.float32)            # [C, TILE_P], cast in-kernel
        labels = labels_ref[0]                                 # [1, TILE_P] int32

        m = jnp.max(logits, axis=0, keepdims=True)             # [1, TILE_P]
        lse = jnp.log(jnp.sum(jnp.exp(logits - m), axis=0, keepdims=True))
        cls = jax.lax.broadcasted_iota(jnp.int32, logits.shape, 0)
        sel = jnp.sum(jnp.where(cls == labels, logits, 0.0), axis=0, keepdims=True)
        # per-pixel CE = logsumexp(logits) - logits[label]
        acc_ref[0] += jnp.sum((m + lse) - sel)

    @pl.when(jnp.logical_and(p == pl.num_programs(0) - 1, n == pl.num_programs(1) - 1))
    def _():
        out_ref[0] = acc_ref[0]


def trim_sparse_loss(output, label, index=None, *, img_size):
    """output: [N, C, H, W] logits (any float dtype), label: [N, H, W] int class map.
    Returns (loss, mask_sum) matching TrimSparseLoss.forward."""
    del index  # unused by the PyTorch forward as well

    N, C, H, W = output.shape
    P = H * W
    logits = output.reshape(N, C, P)              # free reshape, native dtype (no astype)
    labels = label.reshape(N, 1, P)
    if labels.dtype != jnp.int32:
        labels = labels.astype(jnp.int32)

    # Per-example mask from integers (cheap JAX pre-pass over labels only).
    mask = jnp.any(labels != 0, axis=(1, 2))                         # [N] bool
    msum = jnp.sum(mask.astype(jnp.float32))                          # scalar
    mask_i32 = mask.astype(jnp.int32)

    # For masked-out examples, fetch the most recent valid example's block so the block
    # index repeats between consecutive grid steps and the logits/labels DMA is skipped.
    idx = jnp.arange(N, dtype=jnp.int32)
    fetch = jnp.maximum(jax.lax.cummax(jnp.where(mask, idx, -1), axis=0), 0).astype(jnp.int32)

    itemsize = jnp.dtype(logits.dtype).itemsize
    tile_p = _choose_tile_p(P, C, itemsize)
    num_p = P // tile_p

    kernel = functools.partial(_trim_sparse_loss_kernel)

    # TODO(synk): with a single shared SMEM accumulator both grid axes must stay
    # "arbitrary"; per-core accumulators would be needed to mark axes "parallel" on v7x.
    masked_sum = pl.pallas_call(
        kernel,
        out_shape=jax.ShapeDtypeStruct((1,), jnp.float32),
        grid_spec=pltpu.PrefetchScalarGridSpec(
            num_scalar_prefetch=2,
            grid=(num_p, N),
            in_specs=[
                pl.BlockSpec((1, C, tile_p), lambda p, n, m, f: (f[n], 0, p)),
                pl.BlockSpec((1, 1, tile_p), lambda p, n, m, f: (f[n], 0, p)),
            ],
            out_specs=pl.BlockSpec(memory_space=pltpu.MemorySpace.SMEM),
            scratch_shapes=[pltpu.SMEM((1,), jnp.float32)],
        ),
        compiler_params=pltpu.CompilerParams(
            dimension_semantics=("arbitrary", "arbitrary"),
            vmem_limit_bytes=32 * 1024 * 1024,
        ),
    )(mask_i32, fetch, logits, labels)

    total = jnp.float32(img_size * img_size) * msum
    loss = jnp.where(total > 0.0, masked_sum[0] / total, jnp.float32(0.0))
    return loss, msum


def _reference(output, label, img_size):
    logp = jax.nn.log_softmax(output.astype(jnp.float32), axis=1)
    ce = -jnp.take_along_axis(logp, label[:, None, :, :].astype(jnp.int32), axis=1)[:, 0]
    label_sum = jnp.sum(label.astype(jnp.float32), axis=(1, 2))
    mask = (label_sum > 0).astype(jnp.float32)
    total = jnp.float32(img_size * img_size) * jnp.sum(mask)
    loss = jnp.where(total > 0, jnp.sum(ce * mask[:, None, None]) / total, 0.0)
    return loss, jnp.sum(mask)


if __name__ == "__main__":
    key = jax.random.PRNGKey(0)
    k1, k2 = jax.random.split(key)

    N, C, H, W = 2, 4, 16, 16
    img_size = 16

    output = jax.random.normal(k1, (N, C, H, W), dtype=jnp.float32)
    # example 0: random nonzero class labels (masked in), example 1: all zeros (masked out)
    lbl0 = jax.random.randint(k2, (1, H, W), 0, C, dtype=jnp.int32)
    lbl1 = jnp.zeros((1, H, W), dtype=jnp.int32)
    label = jnp.concatenate([lbl0, lbl1], axis=0)
    index = jnp.arange(N, dtype=jnp.int32)  # unused by forward

    loss, msum = trim_sparse_loss(output, label, index, img_size=img_size)
    jax.block_until_ready((loss, msum))

    loss_ref, msum_ref = _reference(output, label, img_size)
    assert jnp.allclose(loss, loss_ref, atol=1e-5, rtol=1e-5), (loss, loss_ref)
    assert jnp.allclose(msum, msum_ref), (msum, msum_ref)

    print("KERNEL_OK")
</pallas_src>

<mosaic_0001>
module attributes {stable_mosaic.version = 11 : i64} {
  func.func @_trim_sparse_loss_kernel(%arg0: i32, %arg1: i32, %arg2: memref<2xi32, #tpu.memory_space<smem>>, %arg3: memref<2xi32, #tpu.memory_space<smem>>, %arg4: memref<1x4x256xf32, #tpu.memory_space<vmem>>, %arg5: memref<1x1x256xi32, #tpu.memory_space<vmem>>, %arg6: memref<1xf32, #tpu.memory_space<smem>>, %arg7: memref<1xf32, #tpu.memory_space<smem>>) attributes {dimension_semantics = [#tpu.dimension_semantics<arbitrary>, #tpu.dimension_semantics<arbitrary>], iteration_bounds = array<i64: 1, 2>, scalar_prefetch = 2 : i64, scratch_operands = 1 : i64, tpu.core_type = #tpu.core_type<tc>, window_params = [{transform_indices = @transform_0, window_bounds = array<i64: 1, 4, 256>}, {transform_indices = @transform_1, window_bounds = array<i64: 1, 1, 256>}, {transform_indices = @transform_2, window_bounds = array<i64: 1>}]} {
    %c0_i32 = arith.constant 0 : i32
    %0 = arith.cmpi eq, %arg0, %c0_i32 : i32
    %c0_i32_0 = arith.constant 0 : i32
    %1 = arith.cmpi eq, %arg1, %c0_i32_0 : i32
    %2 = arith.andi %0, %1 : i1
    %3 = arith.extui %2 : i1 to i32
    %c0_i32_1 = arith.constant 0 : i32
    %4 = arith.cmpi ne, %3, %c0_i32_1 : i32
    scf.if %4 {
      %cst = arith.constant 0.000000e+00 : f32
      %c0 = arith.constant 0 : index
      %15 = memref.load %arg7[%c0] : memref<1xf32, #tpu.memory_space<smem>>
      memref.store %cst, %arg7[%c0] : memref<1xf32, #tpu.memory_space<smem>>
    } else {
    }
    %5 = arith.index_cast %arg1 : i32 to index
    %6 = memref.load %arg2[%5] : memref<2xi32, #tpu.memory_space<smem>>
    %c0_i32_2 = arith.constant 0 : i32
    %7 = arith.cmpi ne, %6, %c0_i32_2 : i32
    %8 = arith.extui %7 : i1 to i32
    %c0_i32_3 = arith.constant 0 : i32
    %9 = arith.cmpi ne, %8, %c0_i32_3 : i32
    scf.if %9 {
      %c0 = arith.constant 0 : index
      %c0_6 = arith.constant 0 : index
      %c0_7 = arith.constant 0 : index
      %15 = vector.load %arg4[%c0, %c0_6, %c0_7] : memref<1x4x256xf32, #tpu.memory_space<vmem>>, vector<1x4x256xf32>
      %16 = vector.shape_cast %15 : vector<1x4x256xf32> to vector<4x256xf32>
      %c0_8 = arith.constant 0 : index
      %c0_9 = arith.constant 0 : index
      %c0_10 = arith.constant 0 : index
      %17 = vector.load %arg5[%c0_8, %c0_9, %c0_10] : memref<1x1x256xi32, #tpu.memory_space<vmem>>, vector<1x1x256xi32>
      %18 = vector.shape_cast %17 : vector<1x1x256xi32> to vector<1x256xi32>
      %cst = arith.constant dense<0xFF800000> : vector<256xf32>
      %19 = vector.multi_reduction <maximumf>, %16, %cst [0] : vector<4x256xf32> to vector<256xf32>
      %20 = vector.shape_cast %19 : vector<256xf32> to vector<1x256xf32>
      %21 = vector.broadcast %20 : vector<1x256xf32> to vector<4x256xf32>
      %22 = arith.subf %16, %21 : vector<4x256xf32>
      %23 = math.exp %22 : vector<4x256xf32>
      %cst_11 = arith.constant dense<0.000000e+00> : vector<256xf32>
      %24 = vector.multi_reduction <add>, %23, %cst_11 [0] : vector<4x256xf32> to vector<256xf32>
      %25 = vector.shape_cast %24 : vector<256xf32> to vector<1x256xf32>
      %26 = math.log %25 : vector<1x256xf32>
      %27 = tpu.iota {dimensions = array<i32: 0>} : vector<4x256xi32>
      %28 = vector.broadcast %18 : vector<1x256xi32> to vector<4x256xi32>
      %29 = arith.cmpi eq, %27, %28 : vector<4x256xi32>
      %cst_12 = arith.constant 0.000000e+00 : f32
      %30 = vector.broadcast %cst_12 : f32 to vector<4x256xf32>
      %31 = arith.select %29, %16, %30 : vector<4x256xi1>, vector<4x256xf32>
      %cst_13 = arith.constant dense<0.000000e+00> : vector<256xf32>
      %32 = vector.multi_reduction <add>, %31, %cst_13 [0] : vector<4x256xf32> to vector<256xf32>
      %33 = vector.shape_cast %32 : vector<256xf32> to vector<1x256xf32>
      %c0_14 = arith.constant 0 : index
      %34 = memref.load %arg7[%c0_14] : memref<1xf32, #tpu.memory_space<smem>>
      %35 = arith.addf %20, %26 : vector<1x256xf32>
      %36 = arith.subf %35, %33 : vector<1x256xf32>
      %37 = vector.shape_cast %36 : vector<1x256xf32> to vector<1x1x256xf32>
      %cst_15 = arith.constant dense<0.000000e+00> : vector<1xf32>
      %38 = vector.multi_reduction <add>, %37, %cst_15 [1, 2] : vector<1x1x256xf32> to vector<1xf32>
      %39 = vector.shape_cast %38 : vector<1xf32> to vector<1x1x1xf32>
      %40 = vector.extract %39[0, 0, 0] : f32 from vector<1x1x1xf32>
      %41 = arith.addf %34, %40 : f32
      %c0_16 = arith.constant 0 : index
      %42 = memref.load %arg7[%c0_16] : memref<1xf32, #tpu.memory_space<smem>>
      memref.store %41, %arg7[%c0_16] : memref<1xf32, #tpu.memory_space<smem>>
    } else {
    }
    %c0_i32_4 = arith.constant 0 : i32
    %10 = arith.cmpi eq, %arg0, %c0_i32_4 : i32
    %c1_i32 = arith.constant 1 : i32
    %11 = arith.cmpi eq, %arg1, %c1_i32 : i32
    %12 = arith.andi %10, %11 : i1
    %13 = arith.extui %12 : i1 to i32
    %c0_i32_5 = arith.constant 0 : i32
    %14 = arith.cmpi ne, %13, %c0_i32_5 : i32
    scf.if %14 {
      %c0 = arith.constant 0 : index
      %15 = memref.load %arg7[%c0] : memref<1xf32, #tpu.memory_space<smem>>
      %c0_6 = arith.constant 0 : index
      %16 = memref.load %arg6[%c0_6] : memref<1xf32, #tpu.memory_space<smem>>
      memref.store %15, %arg6[%c0_6] : memref<1xf32, #tpu.memory_space<smem>>
    } else {
    }
    return
  }
  func.func @transform_0(%arg0: i32, %arg1: i32, %arg2: memref<2xi32, #tpu.memory_space<smem>>, %arg3: memref<2xi32, #tpu.memory_space<smem>>) -> (i32, i32, i32) {
    %0 = arith.index_cast %arg1 : i32 to index
    %1 = memref.load %arg3[%0] : memref<2xi32, #tpu.memory_space<smem>>
    %c0_i32 = arith.constant 0 : i32
    %c0_i32_0 = arith.constant 0 : i32
    return %1, %c0_i32, %arg0 : i32, i32, i32
  }
  func.func @transform_1(%arg0: i32, %arg1: i32, %arg2: memref<2xi32, #tpu.memory_space<smem>>, %arg3: memref<2xi32, #tpu.memory_space<smem>>) -> (i32, i32, i32) {
    %0 = arith.index_cast %arg1 : i32 to index
    %1 = memref.load %arg3[%0] : memref<2xi32, #tpu.memory_space<smem>>
    %c0_i32 = arith.constant 0 : i32
    %c0_i32_0 = arith.constant 0 : i32
    return %1, %c0_i32, %arg0 : i32, i32, i32
  }
  func.func @transform_2(%arg0: i32, %arg1: i32, %arg2: memref<2xi32, #tpu.memory_space<smem>>, %arg3: memref<2xi32, #tpu.memory_space<smem>>) -> i32 {
    %c0_i32 = arith.constant 0 : i32
    %c0_i32_0 = arith.constant 0 : i32
    return %c0_i32 : i32
  }
}

</mosaic_0001>

<bundles_post_ra>
// kernel: tpu_custom_call.1
= control target key start
LH: loop header
LB: loop body
LE: loop exit
PB: predicated region body
PF: predicated region fallthrough
CT: control target
= control target key end

     0   :  { %s831_s0 = inlined_call_operand.hbm [shape: s32[2], index: 0, kind: input, shape index: {}]   ;;  %s832_s2 = inlined_call_operand.hbm [shape: f32[2,4,256], index: 2, kind: input, shape index: {}]   ;;  %s833_s3 = inlined_call_operand.vmem [shape: s32[2,1,256], index: 3, kind: input, shape index: {}]   ;;  %s834_s4 = inlined_call_operand.hbm [shape: f32[1], index: 4, kind: output, shape index: {}]   ;;  %s835_s1 = inlined_call_operand.vmem [shape: s32[2], index: 1, kind: input, shape index: {}]  }
   0x1   :  { %s519_s17 = scalar_lea.hbm %s831_s0, 16 }
   0x2   :  { %p520_p0 = scmp.ne.s32.totalorder %s831_s0, %s519_s17  ;;  %p523_p1 = scmp.lt.u32.totalorder %s519_s17, %s831_s0 }
   0x4   :  { %p525_p2 = pnand %p523_p1, %p520_p0 }
   0x6   :  { %528 = shalt.err (!%p525_p2)  }
   0x7   :  { %s641_s22 = smov [#allocation4]   ;;  %s11_s27 = sshll.u32 %s835_s1, 4  ;;  %s12_s27 = int_to_ptr.vmem [resolvable:$true] %s11_s27 }
   0x8   :  { %10 = dma.hbm_to_smem %s831_s0, 16, %s641_s22, [#allocation3] }
   0x9   :  { %s529_s28 = scalar_lea.vmem %s12_s27, 16  ;;  %p534_p4 = scmp.lt.s32.totalorder %s12_s27, %s12_s27 }
   0xa   :  { %p530_p3 = scmp.ne.s32.totalorder %s12_s27, %s529_s28  ;;  %p535_p5 = scmp.lt.s32.totalorder %s529_s28, %s529_s28 }
   0xc   :  { %p536_p6 = por %p535_p5, %p534_p4 }
   0xe   :  { %p537_p7 = pnand %p536_p6, %p530_p3 }
  0x10   :  { %540 = shalt.err (!%p537_p7)  }
  0x11   :  { %s642_s29 = smov [#allocation5]  }
  0x12   :  { %14 = dma.vmem_to_smem %s12_s27, 16, %s642_s29, [#allocation3] }
  0x13   :  { %607 = dma.done.wait [#allocation3], 32 }
  0x14   :  { %608 = vsyncadd [#allocation3], 4294967264 }
  0x15   :  { %16 = sfence }
  0x16   :  { %17 = vsyncpa [#allocation7], 0 }
  0x17   :  { %19 = vsyncpa [#allocation7 + $0x1], 0 }
  0x18   :  { %20 = vsyncpa [#allocation8], 0  ;;  %s686_s0 = smov 0   ;;  %s688_s30 = smov 0  }
  0x19   :  { %s690_s1 = smov 0   ;;  %s692_s5 = smov 0  }
  0x1a   :  { %s694_s6 = smov 0   ;;  %s696_s7 = smov 0  }
  0x1b LB: > { %s35_s8 = sadd.s32 1, %s635_s6  ;;  %s420_s9 = sadd.s32 4294967295, %s639_s7   ;;  %s639_s7 = sphi %s696_s7, %s26_s7   ;;  %s635_s6 = sphi %s694_s6, %s845_s6   ;;  %s631_s5 = sphi %s692_s5, %s844_s5   ;;  %s627_s1 = sphi %s690_s1, %s843_s1   ;;  %s623_s30 = sphi %s688_s30, %s842_s30   ;;  %s619_s0 = sphi %s686_s0, %s841_s0  }
  0x1c   : > { %p36_p8 = scmp.ge.s32.totalorder %s35_s8, 2  ;;  %s42_s10 = sld [smem:[#allocation5 + %s635_s6]] }
  0x1d   : > { %p56_p9 = scmp.ne.s32.totalorder %s627_s1, %s623_s30  ;;  %p57_p10 = scmp.eq.s32.totalorder %s639_s7, 0 }
  0x1e   : > { %s847_s8 = smov (%p36_p8, %s35_s8), 0  ;;  %p62_p11 = scmp.ne.s32.totalorder %s623_s30, %s619_s0 }
  0x1f   : > { %s43_s11 = sld [smem:[#allocation5 + %s847_s8]]  ;;  %p63_p12 = scmp.eq.s32.totalorder %s420_s9, 0 }
  0x20   : > { %s49_s13 = sadd.s32 1, %s627_s1  ;;  %s137_s14 = sand.u32 1, %s627_s1  }
  0x21   : > { %p726_p13 = por %p63_p12, %p62_p11  ;;  %p58_p0 = por %p57_p10, %p56_p9 }
  0x22   : > { %s423_s15 = sshll.u32 %s137_s14, 3  ;;  %p457_p1 = scmp.lt.s32.totalorder %s639_s7, 2 }
  0x23   : > { %s837_s12 = scalar_select %p726_p13, 1, 0 }
  0x24   : > { %p426_p2 = scmp.ge.s32.totalorder %s639_s7, 1  ;;  %p734_p4 = pnand %p457_p1, %p58_p0 }
  0x25   : > { %s44_s16 = ssub.s32 %s42_s10, %s43_s11  ;;  %p171_p5 = scmp.lt.s32.totalorder %s639_s7, 3 }
  0x26   : > { %p47_p3 = scmp.eq.s32.totalorder %s44_s16, 0  ;;  %s141_s23 = scalar_lea.vmem [#allocation6], %s423_s15 }
  0x27   : > { %s441_s18 = scalar_select %p58_p0, [#allocation5], [#allocation10] }
  0x28   : > { %s739_s19 = scalar_select %p47_p3, %s627_s1, %s49_s13  }
  0x29   : > { %s442_s20 = scalar_select %p58_p0, %s635_s6, 0 }
  0x2a   : > { %s849_s18 = smov (!%p457_p1, %s441_s18), [#allocation11]  ;;  %p743_p6 = pnand %p426_p2, %p171_p5 }
  0x2b   : > { %s851_s20 = smov (!%p457_p1, %s442_s20), 0  ;;  %s152_s24 = sshll.u32 %s141_s23, 4  ;;  %s747_s24 = int_to_ptr.vmem [resolvable:$true] %s152_s24 }
  0x2c   : > { %s142_s21 = sld [smem:[%s849_s18 + %s851_s20]]  ;;  %s138_s29 = scalar_lea.sflag [#allocation7], %s137_s14 }
  0x2d   : > { %p543_p8 = pneg %p734_p4  ;;  %s546_s13 = scalar_lea.hbm %s832_s2, 256 }
  0x32   : > { %s436_s25 = sshll.u32 %s142_s21, 7 }
  0x33   : > { %s752_s28 = scalar_lea.hbm %s832_s2, %s436_s25 }
  0x34   : > { %s541_s0 = scalar_lea.hbm %s752_s28, 128  ;;  %p547_p11 = scmp.lt.u32.totalorder %s752_s28, %s832_s2 }
  0x35   : > { %p542_p7 = scmp.ne.s32.totalorder %s752_s28, %s541_s0  ;;  %p548_p12 = scmp.lt.u32.totalorder %s546_s13, %s541_s0 }
  0x36   : > { %p550_p1 = scmp.lt.u32.totalorder %s541_s0, %s752_s28 }
  0x37   : > { %p544_p9 = pnand %p543_p8, %p542_p7  ;;  %p549_p0 = por %p548_p12, %p547_p11 }
  0x39   : > { %p545_p10 = pneg %p544_p9  ;;  %p551_p2 = por %p550_p1, %p549_p0 }
  0x3b   : > { %p552_p3 = pnand %p551_p2, %p545_p10 }
  0x3d   : > { %555 = shalt.err (!%p552_p3)
}
  0x3e   : > { %s556_s14 = scalar_lea.vmem %s747_s24, 128  ;;  %s643_s18 = smov [#allocation6]  }
  0x3f   : > { %p557_p5 = scmp.ne.s32.totalorder %s747_s24, %s556_s14  ;;  %s561_s20 = sshll.u32 %s643_s18, 4  ;;  %s562_s20 = int_to_ptr.vmem [resolvable:$false] %s561_s20 }
  0x40   : > { %s563_s21 = scalar_lea.vmem %s562_s20, 256  ;;  %p564_p13 = scmp.lt.s32.totalorder %s747_s24, %s562_s20 }
  0x41   : > { %p559_p7 = pnand %p557_p5, %p543_p8  ;;  %p565_p11 = scmp.lt.s32.totalorder %s563_s21, %s556_s14 }
  0x43   : > { %p560_p9 = pneg %p559_p7  ;;  %p566_p12 = por %p565_p11, %p564_p13 }
  0x45   : > { %p567_p0 = pnand %p566_p12, %p560_p9 }
  0x47   : > { %570 = shalt.err (!%p567_p0)
}
  0x48   : > { %456 = dma.hbm_to_vmem [thread:$0]  (!%p734_p4), %s752_s28, 128, %s747_s24, %s138_s29  }
  0x49   : > { %175 = sbr.rel (%p743_p6) target bundleno = 380 (0x17c), region = 28  ;;  %s177_s23 = sand.u32 (!%p743_p6), 1, %s623_s30  }
  0x4a   : > { %s427_s25 = sshll.u32 (!%p743_p6), %s177_s23, 3  ;;  %s178_s26 = scalar_lea.sflag (!%p743_p6), [#allocation7], %s177_s23 }
  0x4b   : > { %s181_s27 = scalar_lea.vmem (!%p743_p6), [#allocation6], %s427_s25  ;;  %p840_p8 = scmp.ne.s32.totalorder (!%p743_p6), %s837_s12, 0 }
  0x50   : > { %610 = dma.done.wait (%p840_p8), %s178_s26, 128  }
  0x51   : > { %612 = vsyncadd (%p840_p8), %s178_s26, 4294967168  ;;  %p220_p13 = scmp.eq.s32.totalorder %s631_s5, 0  ;;  %s208_s17 = sld [smem:[#allocation5 + %s631_s5]] }
  0x52   : > { %s227_s24 = sld [smem:[#allocation4 + %s631_s5]]  ;;  %s644_s28 = smov 0.0  }
  0x53   : > { %445 = sst [smem:[#allocation2]] (%p220_p13), %s644_s28 }
  0x57   : > { %p210_p4 = scmp.lt.s32.totalorder %s208_s17, 1 }
  0x58   : > { %p430_p6 = scmp.eq.s32.totalorder %s227_s24, 0 }
  0x59   : > { %s853_s17 = smov (!%p210_p4, %s208_s17), 1  ;;  %v232_v0 = vld [vmem:[%s181_s27] sm:$0xff] (!%p430_p6)  ;;  %vm237_vm0 = vcmask (!%p430_p6), 1043456   ;;  %v280_v15 = vlaneseq (!%p430_p6)  ;;  %vm313_vm3 = vcmask (!%p430_p6), 1040384   ;;  %s308_s12 = sld [smem:[#allocation2]] (!%p430_p6) }
  0x5a   : > { %s428_s22 = sshll.u32 %s853_s17, 1  ;;  %231 = sbr.rel (%p430_p6) target bundleno = 364 (0x16c), region = 40  ;;  %v235_v1 = vcombine.high (!%p430_p6), %v232_v0, %v232_v0  ;;  %v238_v2 = vsel (!%p430_p6), %vm237_vm0, %v232_v0, -inf }
  0x5b   : > { %s216_s10 = scalar_lea.vmem %s833_s3, %s428_s22  ;;  %v239_v3 = vrot.slane (!%p430_p6), %v238_v2, 4  ;;  %v281_v18 = vshrl.u32 (!%p430_p6), %v280_v15, 7 }
  0x5c   : > { %v245_v4 = vsel (!%p430_p6), %vm237_vm0, %v235_v1, -inf  ;;  %v233_v22 = vld [vmem:[%s216_s10] sm:$0x3] (!%p430_p6) }
  0x5d   : > { %v240_v5 = vmax.f32 (!%p430_p6), %v238_v2, %v239_v3  ;;  %v246_v6 = vrot.slane (!%p430_p6), %v245_v4, 4  ;;  %v284_v21 = vsub.s32 (!%p430_p6), 0, %v281_v18  ;;  %v288_v23 = vsub.s32 (!%p430_p6), 1, %v281_v18 }
  0x5f   : > { %v241_v7 = vrot.slane (!%p430_p6), %v240_v5, 2  ;;  %v247_v8 = vmax.f32 (!%p430_p6), %v245_v4, %v246_v6  ;;  %v285_v24 = vrot.slane (!%p430_p6), %v233_v22, %v284_v21  ;;  %v289_v25 = vrot.slane (!%p430_p6), %v233_v22, %v288_v23 }
  0x61   : > { %v242_v9 = vmax.f32 %v240_v5, %v241_v7  ;;  %v248_v10 = vrot.slane %v247_v8, 2  ;;  %vm290_vm1 = vcmp.eq.s32.totalorder %v281_v18, %v285_v24  ;;  %vm291_vm2 = vcmp.eq.s32.totalorder %v281_v18, %v289_v25 }
  0x62   : > { %v292_v26 = vsel %vm290_vm1, %v232_v0, 0.0  ;;  %v293_v30 = vsel %vm291_vm2, %v235_v1, 0.0 }
  0x63   : > { %v243_v11 = vrot.slane %v242_v9, 1  ;;  %v249_v12 = vmax.f32 %v247_v8, %v248_v10  ;;  %v294_v32 = vsel %vm237_vm0, %v292_v26, 0.0  ;;  %v301_v36 = vsel %vm237_vm0, %v293_v30, 0.0 }
  0x64   : > { %v295_v37 = vrot.slane %v294_v32, 4  ;;  %v302_v40 = vrot.slane %v301_v36, 4 }
  0x65   : > { %v244_v13 = vmax.f32 %v242_v9, %v243_v11  ;;  %v250_v14 = vrot.slane %v249_v12, 1 }
  0x66   : > { %v296_v43 = vadd.f32 %v295_v37, %v294_v32  ;;  %v303_v46 = vadd.f32 %v302_v40, %v301_v36 }
  0x67   : > { %v251_v16 = vmax.f32 %v249_v12, %v250_v14 }
  0x68   : > { %v297_v49 = vrot.slane %v296_v43, 2  ;;  %v304_v51 = vrot.slane %v303_v46, 2 }
  0x69   : > { %v254_v17 = vcombine.low %v244_v13, %v251_v16 }
  0x6a   : > { %v298_v52 = vadd.f32 %v297_v49, %v296_v43  ;;  %v305_v53 = vadd.f32 %v304_v51, %v303_v46 }
  0x6b   : > { %v256_v19 = vsub.f32 %v232_v0, %v254_v17 }
  0x6c   : > { %v299_v54 = vrot.slane %v298_v52, 1  ;;  %v306_v55 = vrot.slane %v305_v53, 1 }
  0x6d   : > { %v257_v20 = vmul.f32 1.442695, %v256_v19 }
  0x6e   : > { %v300_v58 = vadd.f32 %v299_v54, %v298_v52  ;;  %v307_v61 = vadd.f32 %v306_v55, %v305_v53 }
  0x6f   : > { %513 = vpow2.f32 %v257_v20 }
  0x79   : > { %v514_v27 = vpop.eup %513 }
  0x7a   : > { %v260_v28 = vcombine.high %v514_v27, %v514_v27  ;;  %v262_v29 = vsel %vm237_vm0, %v514_v27, 0.0 }
  0x7b   : > { %v263_v31 = vrot.slane %v262_v29, 4 }
  0x7c   : > { %v269_v33 = vsel %vm237_vm0, %v260_v28, 0.0 }
  0x7d   : > { %v264_v34 = vadd.f32 %v263_v31, %v262_v29  ;;  %v270_v35 = vrot.slane %v269_v33, 4 }
  0x7f   : > { %v265_v38 = vrot.slane %v264_v34, 2  ;;  %v271_v39 = vadd.f32 %v270_v35, %v269_v33 }
  0x81   : > { %v266_v41 = vadd.f32 %v265_v38, %v264_v34  ;;  %v272_v42 = vrot.slane %v271_v39, 2 }
  0x83   : > { %v267_v44 = vrot.slane %v266_v41, 1  ;;  %v273_v45 = vadd.f32 %v272_v42, %v271_v39 }
  0x85   : > { %v268_v47 = vadd.f32 %v267_v44, %v266_v41  ;;  %v274_v48 = vrot.slane %v273_v45, 1 }
  0x87   : > { %v275_v50 = vadd.f32 %v274_v48, %v273_v45  ;;  %515 = vlog2.f32 %v268_v47 }
  0x89   : > { %517 = vlog2.f32 %v275_v50 }
  0x91   : > { %v516_v56 = vpop.eup %515 }
  0x92   : > { %v277_v57 = vmul.f32 0.6931472, %v516_v56 }
  0x93   : > { %v518_v59 = vpop.eup %517 }
  0x94   : > { %v279_v60 = vmul.f32 0.6931472, %v518_v59  ;;  %v309_v62 = vadd.f32 %v277_v57, %v244_v13 }
  0x96   : > { %v310_v63 = vadd.f32 %v279_v60, %v251_v16  ;;  %v311_v0 = vsub.f32 %v309_v62, %v300_v58 }
  0x98   : > { %v312_v1 = vsub.f32 %v310_v63, %v307_v61  ;;  %v314_v2 = vsel %vm313_vm3, %v311_v0, 0.0 }
  0x9a   : > { %v315_v3 = vsel %vm313_vm3, %v312_v1, 0.0 }
  0x9b   : > { %v316_v4 = vadd.f32 %v315_v3, %v314_v2 }
  0x9d   : > { %317 = vadd.xlane.f32.xlu0 %v316_v4 }
 0x12a   : > { %v318_v5 = vpop.xlane.xlu0 %317 }
 0x12b   : > { %v319_v6 = vrot.slane %v318_v5, 4 }
 0x12d   : > { %v320_v7 = vadd.f32 %v319_v6, %v318_v5 }
 0x12f   : > { %v321_v8 = vrot.slane %v320_v7, 2 }
 0x131   : > { %v322_v9 = vadd.f32 %v321_v8, %v320_v7 }
 0x133   : > { %v323_v10 = vrot.slane %v322_v9, 1 }
 0x135   : > { %v324_v11 = vadd.f32 %v323_v10, %v322_v9 }
 0x137   : > { %439 = vpush %v324_v11 }
 0x168   : > { %s440_s11 = spop %439 }
 0x169   : > { %s326_s13 = sadd.f32 %s440_s11, %s308_s12 }
 0x16b   : > { %328 = sst [smem:[#allocation2]] %s326_s13 }
 0x16c PF: > { %s334_s15 = sld [smem:[#allocation2]]  ;;  %p329_p10 = scmp.eq.s32.totalorder %s631_s5, 1 }
 0x16d   : > { %p458_p1 = scmp.eq.s32.totalorder %s420_s9, 1  ;;  %s571_s18 = scalar_lea.hbm %s834_s4, 16 }
 0x16e   : > { %p572_p2 = scmp.ne.s32.totalorder %s834_s4, %s571_s18  ;;  %p577_p7 = scmp.lt.u32.totalorder %s571_s18, %s834_s4 }
 0x170   : > { %p573_p3 = pnand %p572_p2, %p458_p1 }
 0x172   : > { %446 = sst [smem:[#allocation9]] (%p329_p10), %s334_s15  ;;  %p574_p5 = pneg %p573_p3 }
 0x174   : > { %p579_p9 = pnand %p577_p7, %p574_p5 }
 0x176   : > { %582 = shalt.err (!%p579_p9)
}
 0x177   : > { %s645_s5 = smov [#allocation9]  }
 0x178   : > { %448 = dma.smem_to_hbm (%p458_p1), %s645_s5, 16, %s834_s4, [#allocation8]  }
 0x179   : > { %614 = dma.done.wait (%p458_p1), [#allocation8], 16  }
 0x17a   : > { %616 = vsyncadd (%p458_p1), [#allocation8], 4294967280 }
 0x17b   : > { %350 = sfence }
 0x17c PF: > { %s26_s7 = sadd.s32 1, %s639_s7   ;;  %s841_s0 = smov %s623_s30 }
 0x17d   : > { %p23_p11 = scmp.ge.s32.totalorder %s26_s7, 4   ;;  %s842_s30 = smov %s627_s1 }
 0x17e   : > { %s843_s1 = smov %s739_s19  ;;  %s844_s5 = smov %s635_s6 }
 0x17f   : > { %s845_s6 = smov %s847_s8  ;;  %25 = sbr.rel (!%p23_p11) target bundleno = 27 (0x1b), region = 83 }
 0x186   :  { %356 = vsyncpa [#allocation7], 1 }
 0x187   :  { %358 = vsyncpa [#allocation7 + $0x1], 1 }
 0x188   :  { %359 = vsyncpa [#allocation8], 1 }
 0x189   :  { %361 = vsyncpa [#allocation8 + $0x1], 1 }

</bundles_post_ra>
